<compile_context>
chip_gen: v6e
topology: v6e:2x2x1
jax: 0.10.0
libtpu: 0.0.40
codegen_flags: <defaults>
</compile_context>

<pallas_src>
import functools

import jax
import jax.numpy as jnp
import numpy as np
from jax.experimental import pallas as pl
from jax.experimental.pallas import tpu as pltpu


# --------------------------------------------------------------------------- #
# Kernel body: one MXU matmul + one fused elementwise add per grid step.
# --------------------------------------------------------------------------- #
def _embed_kernel(patches_ref, w_ref, posb_ref, out_ref):
    # patches_ref: (T, K)      T = block_b * n_patches tokens, K = Cin * p * p
    # w_ref:       (K, Cpad)   conv weight, flattened/transposed/padded on host
    # posb_ref:    (T, Cpad)   position embeddings + bias, pre-tiled & padded
    # out_ref:     (T, Cpad)
    y = jnp.dot(patches_ref[...], w_ref[...],
                preferred_element_type=jnp.float32)          # single MXU matmul
    out_ref[...] = (y + posb_ref[...]).astype(out_ref.dtype)


# --------------------------------------------------------------------------- #
# Host-side helpers.
# --------------------------------------------------------------------------- #
def _round_up(n, m):
    return ((n + m - 1) // m) * m


def _tpu_vmem_and_cores():
    """Best-effort (defensive) query of VMEM capacity and TensorCore count."""
    vmem_cap = 64 << 20          # conservative default (v7x per-TC VMEM)
    num_tc = 1                   # conservative default (v5e / v6e: 1 TC/chip)
    try:
        info = pltpu.get_tpu_info()
        cap = getattr(info, "vmem_capacity_bytes", None)
        if cap:
            vmem_cap = int(cap)
        for attr in ("num_tensorcores", "tensorcore_count", "num_cores",
                     "core_count", "num_cores_per_chip"):
            v = getattr(info, attr, None)
            if v:
                num_tc = int(v)
                break
    except Exception:
        pass
    return vmem_cap, num_tc


def _pick_block_b(B, n_patches, K, c_pad, budget_bytes, num_tc):
    """Largest divisor of B whose block fits the VMEM budget.

    Only forces >= 2 grid steps when the chip has >= 2 TensorCores (v7x);
    on 1-TC chips extra grid steps are serial overhead.
    """
    for cand in range(B, 0, -1):
        if B % cand:
            continue
        steps = B // cand
        if num_tc >= 2 and B >= 2 and steps < 2:
            continue                                    # keep both TCs busy
        rows = cand * n_patches
        if rows % 8 != 0 and cand != B:
            continue                                    # sublane alignment
        need = (2 * rows * K * 4                        # patches (double-buf)
                + 2 * rows * c_pad * 4                  # out     (double-buf)
                + rows * c_pad * 4                      # pos+bias (single-buf)
                + K * c_pad * 4)                        # weight   (single-buf)
        if need > budget_bytes:
            continue
        return cand
    return 1


def _const_spec(shape):
    """BlockSpec for grid-invariant operands; single-buffered when supported."""
    index_map = lambda b: (0,) * len(shape)
    try:
        return pl.BlockSpec(shape, index_map, pipeline_mode=pl.Buffered(1))
    except TypeError:
        return pl.BlockSpec(shape, index_map)


# --------------------------------------------------------------------------- #
# Forward.
# --------------------------------------------------------------------------- #
def channel_embeddings(x, conv_w, conv_b, pos_emb, patch_size):
    """Pallas forward of Channel_Embeddings.forward (dropout = eval identity).

    x:       (B, Cin, H, W)
    conv_w:  (Cout, Cin, p, p)   torch Conv2d weight layout
    conv_b:  (Cout,)
    pos_emb: (1, n_patches, Cout)
    """
    if x is None:
        return None

    B, Cin, H, W = x.shape
    p = int(patch_size)
    Hp, Wp = H // p, W // p
    n_patches = Hp * Wp
    Cout = conv_w.shape[0]
    K = Cin * p * p
    c_pad = _round_up(Cout, 128)          # lane-dense output width

    # ---- host-side layout plumbing (no FLOPs) -------------------------------
    # Crop trailing remainder (Conv2d stride=p / VALID drops it silently).
    x = x[:, :, :Hp * p, :Wp * p]
    # im2col: strided patch-conv == matmul over flattened (Cin, p, p) patches.
    patches = x.reshape(B, Cin, Hp, p, Wp, p)
    patches = jnp.transpose(patches, (0, 2, 4, 1, 3, 5)).reshape(B * n_patches, K)
    patches = patches.astype(jnp.float32)

    # Conv weight -> (K, Cout), zero-padded to (K, c_pad).
    w_t = jnp.transpose(conv_w.reshape(Cout, K), (1, 0)).astype(jnp.float32)
    if c_pad != Cout:
        w_t = jnp.pad(w_t, ((0, 0), (0, c_pad - Cout)))

    # Position embeddings with the conv bias folded in, zero-padded to c_pad.
    pos_bias = (pos_emb.reshape(n_patches, Cout)
                + conv_b.reshape(1, Cout)).astype(jnp.float32)
    if c_pad != Cout:
        pos_bias = jnp.pad(pos_bias, ((0, 0), (0, c_pad - Cout)))

    # ---- generation-aware block sizing & VMEM budget ------------------------
    vmem_cap, num_tc = _tpu_vmem_and_cores()
    vmem_limit = max(16 << 20, min(vmem_cap // 2, 100 << 20))
    block_budget = vmem_limit // 2
    block_b = _pick_block_b(B, n_patches, K, c_pad, block_budget, num_tc)
    rows_per_block = block_b * n_patches
    grid = (B // block_b,)

    # Position embeddings pre-tiled to one row block so the in-kernel add is a
    # plain aligned elementwise add (no modulo indexing / gather).
    pos_block = jnp.tile(pos_bias, (block_b, 1))          # (rows_per_block, c_pad)

    out_padded = pl.pallas_call(
        _embed_kernel,
        out_shape=jax.ShapeDtypeStruct((B * n_patches, c_pad), jnp.float32),
        grid_spec=pltpu.PrefetchScalarGridSpec(
            num_scalar_prefetch=0,
            grid=grid,
            in_specs=[
                pl.BlockSpec((rows_per_block, K), lambda b: (b, 0)),   # patches
                _const_spec((K, c_pad)),                               # weight
                _const_spec((rows_per_block, c_pad)),                  # pos+bias
            ],
            out_specs=pl.BlockSpec((rows_per_block, c_pad), lambda b: (b, 0)),
        ),
        compiler_params=pltpu.CompilerParams(
            dimension_semantics=("parallel",),
            vmem_limit_bytes=int(vmem_limit)),
    )(patches, w_t, pos_block)

    out = out_padded[:, :Cout] if c_pad != Cout else out_padded
    return out.reshape(B, n_patches, Cout)


# --------------------------------------------------------------------------- #
# Pure-JAX reference (port of the torch forward) for correctness checking.
# --------------------------------------------------------------------------- #
def reference(x, conv_w, conv_b, pos_emb, patch_size):
    y = jax.lax.conv_general_dilated(
        x, conv_w,
        window_strides=(patch_size, patch_size),
        padding="VALID",
        dimension_numbers=("NCHW", "OIHW", "NCHW"),
        precision=jax.lax.Precision.HIGHEST)
    y = y + conv_b.reshape(1, -1, 1, 1)
    B, C, Hp, Wp = y.shape
    y = y.reshape(B, C, Hp * Wp)
    y = jnp.transpose(y, (0, 2, 1))            # (B, n_patches, C)
    return y + pos_emb                         # dropout: eval-mode identity


if __name__ == "__main__":
    # Small shapes consistent with the module:
    #   batch=2, in_channels=4, img 16x16, patchsize=4 -> n_patches=16
    B, Cin, H, W = 2, 4, 16, 16
    P = 4
    n_patches = (H // P) * (W // P)

    key = jax.random.PRNGKey(0)
    k_x, k_w, k_b, k_pos = jax.random.split(key, 4)
    x = jax.random.normal(k_x, (B, Cin, H, W), jnp.float32)
    conv_w = jax.random.normal(k_w, (Cin, Cin, P, P), jnp.float32) * 0.1
    conv_b = jax.random.normal(k_b, (Cin,), jnp.float32) * 0.1
    # (torch inits position_embeddings to zeros; use random values for a
    #  meaningful numerical check)
    pos_emb = jax.random.normal(k_pos, (1, n_patches, Cin), jnp.float32) * 0.1

    fwd = jax.jit(functools.partial(channel_embeddings, patch_size=P))
    out = fwd(x, conv_w, conv_b, pos_emb)
    out = jax.block_until_ready(out)

    ref = reference(x, conv_w, conv_b, pos_emb, P)
    np.testing.assert_allclose(np.asarray(out), np.asarray(ref),
                               rtol=1e-3, atol=1e-3)

    print("KERNEL_OK")
</pallas_src>

<mosaic_0001>
module attributes {stable_mosaic.version = 11 : i64} {
  func.func @_embed_kernel(%arg0: i32, %arg1: memref<32x64xf32, #tpu.memory_space<vmem>>, %arg2: memref<64x128xf32, #tpu.memory_space<vmem>>, %arg3: memref<32x128xf32, #tpu.memory_space<vmem>>, %arg4: memref<32x128xf32, #tpu.memory_space<vmem>>) attributes {dimension_semantics = [#tpu.dimension_semantics<parallel>], iteration_bounds = array<i64: 1>, scalar_prefetch = 0 : i64, scratch_operands = 0 : i64, tpu.core_type = #tpu.core_type<tc>, window_params = [{transform_indices = @transform_0, window_bounds = array<i64: 32, 64>}, {pipeline_mode = #tpu.pipeline_mode<synchronous>, transform_indices = @transform_1, window_bounds = array<i64: 64, 128>}, {pipeline_mode = #tpu.pipeline_mode<synchronous>, transform_indices = @transform_2, window_bounds = array<i64: 32, 128>}, {transform_indices = @transform_3, window_bounds = array<i64: 32, 128>}]} {
    %c0 = arith.constant 0 : index
    %c0_0 = arith.constant 0 : index
    %0 = vector.load %arg1[%c0, %c0_0] : memref<32x64xf32, #tpu.memory_space<vmem>>, vector<32x64xf32>
    %c0_1 = arith.constant 0 : index
    %c0_2 = arith.constant 0 : index
    %1 = vector.load %arg2[%c0_1, %c0_2] : memref<64x128xf32, #tpu.memory_space<vmem>>, vector<64x128xf32>
    %cst = arith.constant dense<0.000000e+00> : vector<32x128xf32>
    %2 = tpu.matmul %0, %1, %cst {dimension_numbers = #tpu.dot_dimension_numbers<[1], [0], [0], [1], [0, 0, 1, 1], [], []>} : vector<32x64xf32>, vector<64x128xf32>, vector<32x128xf32> -> vector<32x128xf32>
    %c0_3 = arith.constant 0 : index
    %c0_4 = arith.constant 0 : index
    %3 = vector.load %arg3[%c0_3, %c0_4] : memref<32x128xf32, #tpu.memory_space<vmem>>, vector<32x128xf32>
    %4 = arith.addf %2, %3 : vector<32x128xf32>
    %c0_5 = arith.constant 0 : index
    %c0_6 = arith.constant 0 : index
    %5 = vector.load %arg4[%c0_5, %c0_6] : memref<32x128xf32, #tpu.memory_space<vmem>>, vector<32x128xf32>
    tpu.vector_store %arg4[%c0_5, %c0_6], %4 {strides = array<i32>} : memref<32x128xf32, #tpu.memory_space<vmem>>, vector<32x128xf32>,
    return
  }
  func.func @transform_0(%arg0: i32) -> (i32, i32) {
    %c0_i32 = arith.constant 0 : i32
    %c0_i32_0 = arith.constant 0 : i32
    return %arg0, %c0_i32 : i32, i32
  }
  func.func @transform_1(%arg0: i32) -> (i32, i32) {
    %c0_i32 = arith.constant 0 : i32
    %c0_i32_0 = arith.constant 0 : i32
    %c0_i32_1 = arith.constant 0 : i32
    return %c0_i32, %c0_i32_0 : i32, i32
  }
  func.func @transform_2(%arg0: i32) -> (i32, i32) {
    %c0_i32 = arith.constant 0 : i32
    %c0_i32_0 = arith.constant 0 : i32
    %c0_i32_1 = arith.constant 0 : i32
    return %c0_i32, %c0_i32_0 : i32, i32
  }
  func.func @transform_3(%arg0: i32) -> (i32, i32) {
    %c0_i32 = arith.constant 0 : i32
    %c0_i32_0 = arith.constant 0 : i32
    return %arg0, %c0_i32 : i32, i32
  }
}

</mosaic_0001>

<bundles_post_ra>
// kernel: channel_embeddings.1
= control target key start
LH: loop header
LB: loop body
LE: loop exit
PB: predicated region body
PF: predicated region fallthrough
CT: control target
= control target key end

     0   :  { %vm30_vm0 = vcmask 523264   ;;  %s270_s1 = inlined_call_operand.vmem [shape: f32[64,128], index: 1, kind: input, shape index: {}]   ;;  %s271_s0 = inlined_call_operand.vmem [shape: f32[32,64], index: 0, kind: input, shape index: {}]   ;;  %s272_s2 = inlined_call_operand.vmem [shape: f32[32,128], index: 2, kind: input, shape index: {}]   ;;  %s273_s3 = inlined_call_operand.vmem [shape: f32[32,128], index: 3, kind: output, shape index: {}]  }
   0x1   :  { %v25_v0 = vld [vmem:[%s270_s1 + $0x38] sm:$0xff]  ;;  %v24_v1 = vld [vmem:[%s270_s1 + $0x30] sm:$0xff]  ;;  %v23_v2 = vld [vmem:[%s270_s1 + $0x28] sm:$0xff] }
   0x2   :  { %152 = vmatprep.subr.mxu0 %v25_v0  ;;  %174 = vmatprep.subr.mxu1 %v25_v0  ;;  %v22_v3 = vld [vmem:[%s270_s1 + $0x20] sm:$0xff]  ;;  %v21_v4 = vld [vmem:[%s270_s1 + $0x18] sm:$0xff]  ;;  %v20_v5 = vld [vmem:[%s270_s1 + $0x10] sm:$0xff] }
   0x3   :  { %153 = vmatpush3.msra.mxu0 %v25_v0  ;;  %182 = vmatpush3.msra.mxu1 %v25_v0  ;;  %v19_v6 = vld [vmem:[%s270_s1 + $0x8] sm:$0xff]  ;;  %v18_v7 = vld [vmem:[%s270_s1] sm:$0xff]  ;;  %v16_v9 = vld [vmem:[%s271_s0 + $0x10] sm:$0xff] }
   0x4   :  { %154 = vmatprep.subr.mxu0 %v24_v1  ;;  %175 = vmatprep.subr.mxu1 %v24_v1  ;;  %v14_v8 = vld [vmem:[%s271_s0] sm:$0xff]  ;;  %v15_v10 = vld [vmem:[%s271_s0 + $0x8] sm:$0xff]  ;;  %v17_v11 = vld [vmem:[%s271_s0 + $0x18] sm:$0xff] }
   0x5   :  { %155 = vmatpush3.msra.mxu0 %v24_v1  ;;  %183 = vmatpush3.msra.mxu1 %v24_v1  ;;  %v27_v12 = vld [vmem:[%s272_s2 + $0x8] sm:$0xff]  ;;  %v29_v13 = vld [vmem:[%s272_s2 + $0x18] sm:$0xff]  ;;  %v26_v16 = vld [vmem:[%s272_s2] sm:$0xff] }
   0x6   :  { %156 = vmatprep.subr.mxu0 %v23_v2  ;;  %176 = vmatprep.subr.mxu1 %v23_v2  ;;  %v28_v17 = vld [vmem:[%s272_s2 + $0x10] sm:$0xff] }
   0x7   :  { %157 = vmatpush3.msra.mxu0 %v23_v2  ;;  %184 = vmatpush3.msra.mxu1 %v23_v2 }
   0x8   :  { %158 = vmatprep.subr.mxu0 %v22_v3  ;;  %177 = vmatprep.subr.mxu1 %v22_v3 }
   0x9   :  { %159 = vmatpush3.msra.mxu0 %v22_v3  ;;  %185 = vmatpush3.msra.mxu1 %v22_v3 }
   0xa   :  { %160 = vmatprep.subr.mxu0 %v21_v4  ;;  %178 = vmatprep.subr.mxu1 %v21_v4 }
   0xb   :  { %161 = vmatpush3.msra.mxu0 %v21_v4  ;;  %186 = vmatpush3.msra.mxu1 %v21_v4 }
   0xc   :  { %162 = vmatprep.subr.mxu0 %v20_v5  ;;  %179 = vmatprep.subr.mxu1 %v20_v5 }
   0xd   :  { %163 = vmatpush3.msra.mxu0 %v20_v5  ;;  %187 = vmatpush3.msra.mxu1 %v20_v5 }
   0xe   :  { %164 = vmatprep.subr.mxu0 %v19_v6  ;;  %180 = vmatprep.subr.mxu1 %v19_v6 }
   0xf   :  { %165 = vmatpush3.msra.mxu0 %v19_v6  ;;  %188 = vmatpush3.msra.mxu1 %v19_v6 }
  0x10   :  { %166 = vmatprep.subr.mxu0 %v18_v7  ;;  %181 = vmatprep.subr.mxu1 %v18_v7 }
  0x11   :  { %167 = vmatpush3.msra.mxu0 %v18_v7  ;;  %189 = vmatpush3.msra.mxu1 %v18_v7 }
  0x12   :  { %168 = vmatprep.mubr.msk.f32.mxu0 %vm30_vm0, %v14_v8  ;;  %171 = vmatprep.mubr.msk.f32.mxu1 %vm30_vm0, %v16_v9 }
  0x13   :  { %169 = vmatmul.mubr.msk.f32.vlgmr.msra.gmra.mxu0 %vm30_vm0, %v15_v10  ;;  %172 = vmatmul.mubr.msk.f32.vlgmr.msra.gmra.mxu1 %vm30_vm0, %v17_v11 }
  0xd3   :  { %v170_v14 = vpop.f32.mrf.mxu0  ;;  %v173_v15 = vpop.f32.mrf.mxu1 }
  0xd4   :  { %v115_v18 = vadd.f32 %v170_v14, %v27_v12  ;;  %v125_v19 = vadd.f32 %v173_v15, %v29_v13 }
  0xd5   :  { %v109_v20 = vpop.f32.mrf.mxu0  ;;  %v119_v21 = vpop.f32.mrf.mxu1 }
  0xd6   :  { %129 = vst [vmem:[%s273_s3 + $0x8] sm:$0xff] %v115_v18  ;;  %131 = vst [vmem:[%s273_s3 + $0x18] sm:$0xff] %v125_v19  ;;  %v110_v22 = vadd.f32 %v109_v20, %v26_v16  ;;  %v120_v23 = vadd.f32 %v119_v21, %v28_v17 }
  0xd8   :  { %128 = vst [vmem:[%s273_s3] sm:$0xff] %v110_v22  ;;  %130 = vst [vmem:[%s273_s3 + $0x10] sm:$0xff] %v120_v23 }

</bundles_post_ra>
